<compile_context>
chip_gen: v5e
topology: v5e:2x2
jax: 0.10.0
libtpu: 0.0.40
codegen_flags: <defaults>
</compile_context>

<pallas_src>
import functools

import jax
import jax.numpy as jnp
from jax.experimental import pallas as pl
from jax.experimental.pallas import tpu as pltpu


def _round_up(x, m):
    return (x + m - 1) // m * m


def _cdiv(a, b):
    return -(-a // b)


def _vmem_limit_bytes():
    """Generation-aware scoped-VMEM limit: ~70% of physical, capped at 100 MiB.

    v5e/v6e (128 MiB physical) -> ~89 MiB, v7x (64 MiB) -> ~44 MiB.  Falls back
    to a v7x-safe value if the hardware query is unavailable.
    """
    cap = 64 * 1024 * 1024
    try:
        info = pltpu.get_tpu_info()
        cap = int(getattr(info, "vmem_capacity_bytes", cap))
    except Exception:
        pass
    return min(int(cap * 0.7), 100 * 1024 * 1024)


# --------------------------- fused 1x1-conv heads ----------------------------


def _fused_head_kernel(a_ref, w_ref, b_ref, o_ref):
    # a: (TM, K), w: (K, CP), b: (1, CP) -> o: (TM, CP)   (CP = 128-padded)
    acc = jnp.dot(a_ref[...], w_ref[...], preferred_element_type=jnp.float32)
    o_ref[...] = (acc + b_ref[...]).astype(o_ref.dtype)


def pallas_fused_heads(feat2d, w_fused, b_fused, *, tm_max=2048):
    """feat2d: (M, K) f32;  w_fused: (K, CP);  b_fused: (1, CP) -> (M, CP)."""
    m, k = feat2d.shape
    k2, cp = w_fused.shape
    assert k == k2 and b_fused.shape == (1, cp) and cp % 128 == 0

    # Even number (>=2) of row blocks so the "parallel" grid axis shards across
    # both v7x TensorCores; big tm amortizes ~0.35us/grid-step overhead.
    if m <= 8:
        nb = 1
    else:
        nb = max(2, _cdiv(m, tm_max))
        nb = _round_up(nb, 2)
    tm = _round_up(_cdiv(m, nb), 8)
    m_pad = tm * nb
    if m_pad != m:
        feat2d = jnp.pad(feat2d, ((0, m_pad - m), (0, 0)))

    out = pl.pallas_call(
        _fused_head_kernel,
        out_shape=jax.ShapeDtypeStruct((m_pad, cp), jnp.float32),
        grid=(nb,),
        in_specs=[
            pl.BlockSpec((tm, k), lambda i: (i, 0)),
            pl.BlockSpec((k, cp), lambda i: (0, 0)),
            pl.BlockSpec((1, cp), lambda i: (0, 0)),
        ],
        out_specs=pl.BlockSpec((tm, cp), lambda i: (i, 0)),
        compiler_params=pltpu.CompilerParams(
            dimension_semantics=("parallel",),
            vmem_limit_bytes=_vmem_limit_bytes()),
    )(feat2d, w_fused, b_fused)
    return out[:m] if m_pad != m else out


# ------------------------------ bilinear resize -------------------------------


def _bilinear_nchw_kernel(rh_ref, rwt_ref, x_ref, o_ref):
    # rh: (TH, Hin), rwt: (Win, Wout), x: (1, Cblk, Hin, Win)
    # -> o: (1, Cblk, TH, Wout)        out[c] = Rh_tile @ x[c] @ Rw^T
    #
    # No broadcast_to of Rh / Rw^T.  H-resize: Cblk small matmuls that reuse
    # the same (TH, Hin) LHS.  W-resize: one long (Cblk*TH, Win) @ (Win, Wout)
    # matmul so the RHS stays resident in the MXU and stores are lane-dense.
    rh = rh_ref[...]
    cblk = x_ref.shape[1]
    th = rh.shape[0]
    parts = [jnp.dot(rh, x_ref[0, c], preferred_element_type=jnp.float32)
             for c in range(cblk)]                                  # (TH, Win) each
    t1 = parts[0] if cblk == 1 else jnp.concatenate(parts, axis=0)  # (Cblk*TH, Win)
    big = jnp.dot(t1, rwt_ref[...], preferred_element_type=jnp.float32)  # (Cblk*TH, Wout)
    for c in range(cblk):
        o_ref[0, c] = big[c * th:(c + 1) * th, :]


def _resize_matrix(out_size, in_size):
    """Interpolation matrix matching F.interpolate(bilinear, align_corners=False)."""
    scale = in_size / out_size
    o = jnp.arange(out_size, dtype=jnp.float32)
    src = jnp.clip((o + 0.5) * scale - 0.5, 0.0, float(in_size - 1))
    x0 = jnp.floor(src)
    frac = src - x0
    x0i = x0.astype(jnp.int32)
    x1i = jnp.minimum(x0i + 1, in_size - 1)
    rows = jnp.arange(out_size)
    r = jnp.zeros((out_size, in_size), dtype=jnp.float32)
    r = r.at[rows, x0i].add(1.0 - frac)
    r = r.at[rows, x1i].add(frac)
    return r


def _resize_tiles(c, h_in, w_in, h_out, w_out, budget_bytes, *,
                  c_blk_max=8, th_max=512):
    """Pick (c_blk, th) so the per-grid-step working set fits the VMEM budget.

    Working set = double-buffered input/output/weight blocks + live matmul
    values.  Shrinks c_blk before th (v7x 64 MiB guidance).
    """
    def per_step_bytes(cb, th):
        x_blk = 2 * cb * h_in * w_in * 4          # double-buffered input
        o_blk = 2 * cb * th * w_out * 4           # double-buffered output
        rh_blk = 2 * th * h_in * 4
        rw_blk = 2 * w_in * w_out * 4
        live = cb * th * (w_in + w_out) * 4       # t1 + W-resize result
        return x_blk + o_blk + rh_blk + rw_blk + live

    th_cands = [t for t in range(8, min(h_out, th_max) + 1, 8) if h_out % t == 0]
    if not th_cands:
        # TODO(synk): no multiple-of-8 divisor <= th_max -> full-extent H tile;
        # a partial-last-tile (pl.cdiv + masked store) variant would be tighter.
        th_cands = [h_out]
    cb_cands = [d for d in range(1, min(c, c_blk_max) + 1) if c % d == 0]

    cb, th = cb_cands[-1], th_cands[-1]
    while per_step_bytes(cb, th) > budget_bytes and cb > cb_cands[0]:
        cb = max(d for d in cb_cands if d < cb)
    while per_step_bytes(cb, th) > budget_bytes and th > th_cands[0]:
        th = max(t for t in th_cands if t < th)
    return cb, th


def pallas_bilinear_resize_nchw(x, out_hw, *, c_blk_max=8, th_max=512):
    """x: (N, C, Hin, Win) -> (N, C, Hout, Wout), bilinear, align_corners=False."""
    n, c, h_in, w_in = x.shape
    h_out, w_out = out_hw
    rh = _resize_matrix(h_out, h_in)               # (Hout, Hin)
    rwt = _resize_matrix(w_out, w_in).T            # (Win, Wout)

    vmem_limit = _vmem_limit_bytes()
    cb, th = _resize_tiles(c, h_in, w_in, h_out, w_out,
                           int(vmem_limit * 0.6),
                           c_blk_max=c_blk_max, th_max=th_max)

    return pl.pallas_call(
        _bilinear_nchw_kernel,
        out_shape=jax.ShapeDtypeStruct((n, c, h_out, w_out), jnp.float32),
        grid=(n, c // cb, h_out // th),
        in_specs=[
            pl.BlockSpec((th, h_in), lambda b, ci, hi: (hi, 0)),
            pl.BlockSpec((w_in, w_out), lambda b, ci, hi: (0, 0)),
            pl.BlockSpec((1, cb, h_in, w_in), lambda b, ci, hi: (b, ci, 0, 0)),
        ],
        out_specs=pl.BlockSpec((1, cb, th, w_out),
                               lambda b, ci, hi: (b, ci, hi, 0)),
        compiler_params=pltpu.CompilerParams(
            dimension_semantics=("parallel", "parallel", "parallel"),
            vmem_limit_bytes=vmem_limit),
    )(rh, rwt, x)


# -------------------------- ModelWraper forward pass --------------------------


def init_params(key, in_ch, loc_ch, cls_ch):
    k1, k2, k3, k4 = jax.random.split(key, 4)
    return {
        "w_loc": jax.random.normal(k1, (in_ch, loc_ch), jnp.float32) * 0.1,
        "b_loc": jax.random.normal(k2, (1, loc_ch), jnp.float32) * 0.1,
        "w_cls": jax.random.normal(k3, (in_ch, cls_ch), jnp.float32) * 0.1,
        "b_cls": jax.random.normal(k4, (1, cls_ch), jnp.float32) * 0.1,
    }


def model_wraper_forward(params, inputs_pre, inputs_post, is_split_loss=True,
                         stride=4):
    n, c, h, w = inputs_pre.shape
    loc_ch = params["w_loc"].shape[1]
    cls_ch = params["w_cls"].shape[1]
    c_tot = loc_ch + cls_ch

    # --- synthetic inner model feature prep: stride-4 downsample, NHWC so the
    #     pre/post concat happens along the contiguous lane dim ---
    # TODO(synk): fusing the strided downsample/concat into the head kernel
    # (pl.ANY refs + manual strided DMA) and feeding the head's NHWC output
    # straight into the resize would remove two intermediate HBM round-trips;
    # kept in XLA here since those tensors are the small (stride^2-reduced) maps.
    pre_s = jnp.transpose(inputs_pre[:, :, ::stride, ::stride], (0, 2, 3, 1))
    post_s = jnp.transpose(inputs_post[:, :, ::stride, ::stride], (0, 2, 3, 1))
    feat = jnp.concatenate([pre_s, post_s], axis=-1)        # (N, hs, ws, 2C)
    hs, ws, k = feat.shape[1], feat.shape[2], feat.shape[3]
    feat2d = feat.reshape(n * hs * ws, k)

    # --- fused loc+cls heads, zero-padded to a 128-wide (lane-dense) output ---
    cp = _round_up(c_tot, 128)
    w_fused = jnp.concatenate([params["w_loc"], params["w_cls"]], axis=1)
    b_fused = jnp.concatenate([params["b_loc"], params["b_cls"]], axis=1)
    w_fused = jnp.pad(w_fused, ((0, 0), (0, cp - c_tot)))
    b_fused = jnp.pad(b_fused, ((0, 0), (0, cp - c_tot)))
    y = pallas_fused_heads(feat2d, w_fused, b_fused)        # (N*hs*ws, cp)

    # Drop padded channels, relayout the SMALL maps (cheap) to NCHW for resize.
    small = y.reshape(n, hs, ws, cp)[..., :c_tot]           # (N, hs, ws, Ctot)
    small = jnp.transpose(small, (0, 3, 1, 2))              # (N, Ctot, hs, ws)

    # --- ModelWraper.forward: bilinear upsample each prediction to the input
    #     size.  loc and cls come from SEPARATE resize calls so the large
    #     upsampled tensor is never channel-sliced post hoc in XLA (that slice
    #     costs a full extra HBM read+write of the biggest tensor).
    loc = pallas_bilinear_resize_nchw(small[:, :loc_ch], (h, w))   # (N, loc, H, W)
    if is_split_loss:
        cls = pallas_bilinear_resize_nchw(small[:, loc_ch:], (h, w))
    else:
        cls = None
    return loc, cls


if __name__ == "__main__":
    N, C, H, W = 2, 4, 16, 16
    LOC_CH, CLS_CH = 2, 5

    key = jax.random.PRNGKey(0)
    k_pre, k_post = jax.random.split(key)
    inputs_pre = jax.random.normal(k_pre, (N, C, H, W), dtype=jnp.float32)
    inputs_post = jax.random.normal(k_post, (N, C, H, W), dtype=jnp.float32)

    params = init_params(jax.random.PRNGKey(42), in_ch=2 * C,
                         loc_ch=LOC_CH, cls_ch=CLS_CH)

    fwd = jax.jit(functools.partial(model_wraper_forward, is_split_loss=True))
    loc, cls = fwd(params, inputs_pre, inputs_post)
    jax.block_until_ready((loc, cls))

    assert loc.shape == (N, LOC_CH, H, W), loc.shape
    assert cls.shape == (N, CLS_CH, H, W), cls.shape
    assert loc.dtype == jnp.float32 and cls.dtype == jnp.float32
    print("KERNEL_OK")
</pallas_src>

<mosaic_0001>
module attributes {stable_mosaic.version = 11 : i64} {
  func.func @_fused_head_kernel(%arg0: i32, %arg1: memref<16x8xf32, #tpu.memory_space<vmem>>, %arg2: memref<8x128xf32, #tpu.memory_space<vmem>>, %arg3: memref<1x128xf32, #tpu.memory_space<vmem>>, %arg4: memref<16x128xf32, #tpu.memory_space<vmem>>) attributes {dimension_semantics = [#tpu.dimension_semantics<parallel>], iteration_bounds = array<i64: 2>, scalar_prefetch = 0 : i64, scratch_operands = 0 : i64, tpu.core_type = #tpu.core_type<tc>, window_params = [{transform_indices = @transform_0, window_bounds = array<i64: 16, 8>}, {pipeline_mode = #tpu.pipeline_mode<synchronous>, transform_indices = @transform_1, window_bounds = array<i64: 8, 128>}, {pipeline_mode = #tpu.pipeline_mode<synchronous>, transform_indices = @transform_2, window_bounds = array<i64: 1, 128>}, {transform_indices = @transform_3, window_bounds = array<i64: 16, 128>}]} {
    %c0 = arith.constant 0 : index
    %c0_0 = arith.constant 0 : index
    %0 = vector.load %arg1[%c0, %c0_0] : memref<16x8xf32, #tpu.memory_space<vmem>>, vector<16x8xf32>
    %c0_1 = arith.constant 0 : index
    %c0_2 = arith.constant 0 : index
    %1 = vector.load %arg2[%c0_1, %c0_2] : memref<8x128xf32, #tpu.memory_space<vmem>>, vector<8x128xf32>
    %cst = arith.constant dense<0.000000e+00> : vector<16x128xf32>
    %2 = tpu.matmul %0, %1, %cst {dimension_numbers = #tpu.dot_dimension_numbers<[1], [0], [0], [1], [0, 0, 1, 1], [], []>} : vector<16x8xf32>, vector<8x128xf32>, vector<16x128xf32> -> vector<16x128xf32>
    %c0_3 = arith.constant 0 : index
    %c0_4 = arith.constant 0 : index
    %3 = vector.load %arg3[%c0_3, %c0_4] : memref<1x128xf32, #tpu.memory_space<vmem>>, vector<1x128xf32>
    %4 = vector.broadcast %3 : vector<1x128xf32> to vector<16x128xf32>
    %5 = arith.addf %2, %4 : vector<16x128xf32>
    %c0_5 = arith.constant 0 : index
    %c0_6 = arith.constant 0 : index
    %6 = vector.load %arg4[%c0_5, %c0_6] : memref<16x128xf32, #tpu.memory_space<vmem>>, vector<16x128xf32>
    tpu.vector_store %arg4[%c0_5, %c0_6], %5 {strides = array<i32>} : memref<16x128xf32, #tpu.memory_space<vmem>>, vector<16x128xf32>,
    return
  }
  func.func @transform_0(%arg0: i32) -> (i32, i32) {
    %c0_i32 = arith.constant 0 : i32
    %c0_i32_0 = arith.constant 0 : i32
    return %arg0, %c0_i32 : i32, i32
  }
  func.func @transform_1(%arg0: i32) -> (i32, i32) {
    %c0_i32 = arith.constant 0 : i32
    %c0_i32_0 = arith.constant 0 : i32
    %c0_i32_1 = arith.constant 0 : i32
    return %c0_i32, %c0_i32_0 : i32, i32
  }
  func.func @transform_2(%arg0: i32) -> (i32, i32) {
    %c0_i32 = arith.constant 0 : i32
    %c0_i32_0 = arith.constant 0 : i32
    %c0_i32_1 = arith.constant 0 : i32
    return %c0_i32, %c0_i32_0 : i32, i32
  }
  func.func @transform_3(%arg0: i32) -> (i32, i32) {
    %c0_i32 = arith.constant 0 : i32
    %c0_i32_0 = arith.constant 0 : i32
    return %arg0, %c0_i32 : i32, i32
  }
}

module attributes {stable_mosaic.version = 11 : i64} {
  func.func @_bilinear_nchw_kernel(%arg0: i32, %arg1: i32, %arg2: i32, %arg3: memref<16x4xf32, #tpu.memory_space<vmem>>, %arg4: memref<4x16xf32, #tpu.memory_space<vmem>>, %arg5: memref<1x5x4x4xf32, #tpu.memory_space<vmem>>, %arg6: memref<1x5x16x16xf32, #tpu.memory_space<vmem>>) attributes {dimension_semantics = [#tpu.dimension_semantics<parallel>, #tpu.dimension_semantics<parallel>, #tpu.dimension_semantics<parallel>], iteration_bounds = array<i64: 2, 1, 1>, scalar_prefetch = 0 : i64, scratch_operands = 0 : i64, tpu.core_type = #tpu.core_type<tc>, window_params = [{transform_indices = @transform_0, window_bounds = array<i64: 16, 4>}, {pipeline_mode = #tpu.pipeline_mode<synchronous>, transform_indices = @transform_1, window_bounds = array<i64: 4, 16>}, {transform_indices = @transform_2, window_bounds = array<i64: 1, 5, 4, 4>}, {transform_indices = @transform_3, window_bounds = array<i64: 1, 5, 16, 16>}]} {
    %c0 = arith.constant 0 : index
    %c0_0 = arith.constant 0 : index
    %0 = vector.load %arg3[%c0, %c0_0] : memref<16x4xf32, #tpu.memory_space<vmem>>, vector<16x4xf32>
    %c0_1 = arith.constant 0 : index
    %c0_2 = arith.constant 0 : index
    %c0_3 = arith.constant 0 : index
    %c0_4 = arith.constant 0 : index
    %1 = vector.load %arg5[%c0_1, %c0_2, %c0_3, %c0_4] : memref<1x5x4x4xf32, #tpu.memory_space<vmem>>, vector<1x1x4x4xf32>
    %2 = vector.shape_cast %1 : vector<1x1x4x4xf32> to vector<4x4xf32>
    %cst = arith.constant dense<0.000000e+00> : vector<16x4xf32>
    %3 = tpu.matmul %0, %2, %cst {dimension_numbers = #tpu.dot_dimension_numbers<[1], [0], [0], [1], [0, 0, 1, 1], [], []>} : vector<16x4xf32>, vector<4x4xf32>, vector<16x4xf32> -> vector<16x4xf32>
    %c0_5 = arith.constant 0 : index
    %c1 = arith.constant 1 : index
    %c0_6 = arith.constant 0 : index
    %c0_7 = arith.constant 0 : index
    %4 = vector.load %arg5[%c0_5, %c1, %c0_6, %c0_7] : memref<1x5x4x4xf32, #tpu.memory_space<vmem>>, vector<1x1x4x4xf32>
    %5 = vector.shape_cast %4 : vector<1x1x4x4xf32> to vector<4x4xf32>
    %cst_8 = arith.constant dense<0.000000e+00> : vector<16x4xf32>
    %6 = tpu.matmul %0, %5, %cst_8 {dimension_numbers = #tpu.dot_dimension_numbers<[1], [0], [0], [1], [0, 0, 1, 1], [], []>} : vector<16x4xf32>, vector<4x4xf32>, vector<16x4xf32> -> vector<16x4xf32>
    %c0_9 = arith.constant 0 : index
    %c2 = arith.constant 2 : index
    %c0_10 = arith.constant 0 : index
    %c0_11 = arith.constant 0 : index
    %7 = vector.load %arg5[%c0_9, %c2, %c0_10, %c0_11] : memref<1x5x4x4xf32, #tpu.memory_space<vmem>>, vector<1x1x4x4xf32>
    %8 = vector.shape_cast %7 : vector<1x1x4x4xf32> to vector<4x4xf32>
    %cst_12 = arith.constant dense<0.000000e+00> : vector<16x4xf32>
    %9 = tpu.matmul %0, %8, %cst_12 {dimension_numbers = #tpu.dot_dimension_numbers<[1], [0], [0], [1], [0, 0, 1, 1], [], []>} : vector<16x4xf32>, vector<4x4xf32>, vector<16x4xf32> -> vector<16x4xf32>
    %c0_13 = arith.constant 0 : index
    %c3 = arith.constant 3 : index
    %c0_14 = arith.constant 0 : index
    %c0_15 = arith.constant 0 : index
    %10 = vector.load %arg5[%c0_13, %c3, %c0_14, %c0_15] : memref<1x5x4x4xf32, #tpu.memory_space<vmem>>, vector<1x1x4x4xf32>
    %11 = vector.shape_cast %10 : vector<1x1x4x4xf32> to vector<4x4xf32>
    %cst_16 = arith.constant dense<0.000000e+00> : vector<16x4xf32>
    %12 = tpu.matmul %0, %11, %cst_16 {dimension_numbers = #tpu.dot_dimension_numbers<[1], [0], [0], [1], [0, 0, 1, 1], [], []>} : vector<16x4xf32>, vector<4x4xf32>, vector<16x4xf32> -> vector<16x4xf32>
    %c0_17 = arith.constant 0 : index
    %c4 = arith.constant 4 : index
    %c0_18 = arith.constant 0 : index
    %c0_19 = arith.constant 0 : index
    %13 = vector.load %arg5[%c0_17, %c4, %c0_18, %c0_19] : memref<1x5x4x4xf32, #tpu.memory_space<vmem>>, vector<1x1x4x4xf32>
    %14 = vector.shape_cast %13 : vector<1x1x4x4xf32> to vector<4x4xf32>
    %cst_20 = arith.constant dense<0.000000e+00> : vector<16x4xf32>
    %15 = tpu.matmul %0, %14, %cst_20 {dimension_numbers = #tpu.dot_dimension_numbers<[1], [0], [0], [1], [0, 0, 1, 1], [], []>} : vector<16x4xf32>, vector<4x4xf32>, vector<16x4xf32> -> vector<16x4xf32>
    %16 = tpu.concatenate %3, %6, %9, %12, %15 in 0 : vector<16x4xf32>, vector<16x4xf32>, vector<16x4xf32>, vector<16x4xf32>, vector<16x4xf32> -> vector<80x4xf32>
    %c0_21 = arith.constant 0 : index
    %c0_22 = arith.constant 0 : index
    %17 = vector.load %arg4[%c0_21, %c0_22] : memref<4x16xf32, #tpu.memory_space<vmem>>, vector<4x16xf32>
    %cst_23 = arith.constant dense<0.000000e+00> : vector<80x16xf32>
    %18 = tpu.matmul %16, %17, %cst_23 {dimension_numbers = #tpu.dot_dimension_numbers<[1], [0], [0], [1], [0, 0, 1, 1], [], []>} : vector<80x4xf32>, vector<4x16xf32>, vector<80x16xf32> -> vector<80x16xf32>
    %19 = vector.extract_strided_slice %18 {offsets = [0, 0], sizes = [16, 16], strides = [1, 1]} : vector<80x16xf32> to vector<16x16xf32>
    %c0_24 = arith.constant 0 : index
    %c0_25 = arith.constant 0 : index
    %c0_26 = arith.constant 0 : index
    %c0_27 = arith.constant 0 : index
    %20 = vector.load %arg6[%c0_24, %c0_25, %c0_26, %c0_27] : memref<1x5x16x16xf32, #tpu.memory_space<vmem>>, vector<1x1x16x16xf32>
    %21 = vector.shape_cast %20 : vector<1x1x16x16xf32> to vector<16x16xf32>
    %22 = vector.shape_cast %19 : vector<16x16xf32> to vector<1x1x16x16xf32>
    tpu.vector_store %arg6[%c0_24, %c0_25, %c0_26, %c0_27], %22 {strides = array<i32>} : memref<1x5x16x16xf32, #tpu.memory_space<vmem>>, vector<1x1x16x16xf32>,
    %23 = vector.extract_strided_slice %18 {offsets = [16, 0], sizes = [16, 16], strides = [1, 1]} : vector<80x16xf32> to vector<16x16xf32>
    %c0_28 = arith.constant 0 : index
    %c1_29 = arith.constant 1 : index
    %c0_30 = arith.constant 0 : index
    %c0_31 = arith.constant 0 : index
    %24 = vector.load %arg6[%c0_28, %c1_29, %c0_30, %c0_31] : memref<1x5x16x16xf32, #tpu.memory_space<vmem>>, vector<1x1x16x16xf32>
    %25 = vector.shape_cast %24 : vector<1x1x16x16xf32> to vector<16x16xf32>
    %26 = vector.shape_cast %23 : vector<16x16xf32> to vector<1x1x16x16xf32>
    tpu.vector_store %arg6[%c0_28, %c1_29, %c0_30, %c0_31], %26 {strides = array<i32>} : memref<1x5x16x16xf32, #tpu.memory_space<vmem>>, vector<1x1x16x16xf32>,
    %27 = vector.extract_strided_slice %18 {offsets = [32, 0], sizes = [16, 16], strides = [1, 1]} : vector<80x16xf32> to vector<16x16xf32>
    %c0_32 = arith.constant 0 : index
    %c2_33 = arith.constant 2 : index
    %c0_34 = arith.constant 0 : index
    %c0_35 = arith.constant 0 : index
    %28 = vector.load %arg6[%c0_32, %c2_33, %c0_34, %c0_35] : memref<1x5x16x16xf32, #tpu.memory_space<vmem>>, vector<1x1x16x16xf32>
    %29 = vector.shape_cast %28 : vector<1x1x16x16xf32> to vector<16x16xf32>
    %30 = vector.shape_cast %27 : vector<16x16xf32> to vector<1x1x16x16xf32>
    tpu.vector_store %arg6[%c0_32, %c2_33, %c0_34, %c0_35], %30 {strides = array<i32>} : memref<1x5x16x16xf32, #tpu.memory_space<vmem>>, vector<1x1x16x16xf32>,
    %31 = vector.extract_strided_slice %18 {offsets = [48, 0], sizes = [16, 16], strides = [1, 1]} : vector<80x16xf32> to vector<16x16xf32>
    %c0_36 = arith.constant 0 : index
    %c3_37 = arith.constant 3 : index
    %c0_38 = arith.constant 0 : index
    %c0_39 = arith.constant 0 : index
    %32 = vector.load %arg6[%c0_36, %c3_37, %c0_38, %c0_39] : memref<1x5x16x16xf32, #tpu.memory_space<vmem>>, vector<1x1x16x16xf32>
    %33 = vector.shape_cast %32 : vector<1x1x16x16xf32> to vector<16x16xf32>
    %34 = vector.shape_cast %31 : vector<16x16xf32> to vector<1x1x16x16xf32>
    tpu.vector_store %arg6[%c0_36, %c3_37, %c0_38, %c0_39], %34 {strides = array<i32>} : memref<1x5x16x16xf32, #tpu.memory_space<vmem>>, vector<1x1x16x16xf32>,
    %35 = vector.extract_strided_slice %18 {offsets = [64, 0], sizes = [16, 16], strides = [1, 1]} : vector<80x16xf32> to vector<16x16xf32>
    %c0_40 = arith.constant 0 : index
    %c4_41 = arith.constant 4 : index
    %c0_42 = arith.constant 0 : index
    %c0_43 = arith.constant 0 : index
    %36 = vector.load %arg6[%c0_40, %c4_41, %c0_42, %c0_43] : memref<1x5x16x16xf32, #tpu.memory_space<vmem>>, vector<1x1x16x16xf32>
    %37 = vector.shape_cast %36 : vector<1x1x16x16xf32> to vector<16x16xf32>
    %38 = vector.shape_cast %35 : vector<16x16xf32> to vector<1x1x16x16xf32>
    tpu.vector_store %arg6[%c0_40, %c4_41, %c0_42, %c0_43], %38 {strides = array<i32>} : memref<1x5x16x16xf32, #tpu.memory_space<vmem>>, vector<1x1x16x16xf32>,
    return
  }
  func.func @transform_0(%arg0: i32, %arg1: i32, %arg2: i32) -> (i32, i32) {
    %c0_i32 = arith.constant 0 : i32
    %c0_i32_0 = arith.constant 0 : i32
    return %arg2, %c0_i32 : i32, i32
  }
  func.func @transform_1(%arg0: i32, %arg1: i32, %arg2: i32) -> (i32, i32) {
    %c0_i32 = arith.constant 0 : i32
    %c0_i32_0 = arith.constant 0 : i32
    %c0_i32_1 = arith.constant 0 : i32
    return %c0_i32, %c0_i32_0 : i32, i32
  }
  func.func @transform_2(%arg0: i32, %arg1: i32, %arg2: i32) -> (i32, i32, i32, i32) {
    %c0_i32 = arith.constant 0 : i32
    %c0_i32_0 = arith.constant 0 : i32
    %c0_i32_1 = arith.constant 0 : i32
    return %arg0, %arg1, %c0_i32, %c0_i32_0 : i32, i32, i32, i32
  }
  func.func @transform_3(%arg0: i32, %arg1: i32, %arg2: i32) -> (i32, i32, i32, i32) {
    %c0_i32 = arith.constant 0 : i32
    %c0_i32_0 = arith.constant 0 : i32
    return %arg0, %arg1, %arg2, %c0_i32 : i32, i32, i32, i32
  }
}

module attributes {stable_mosaic.version = 11 : i64} {
  func.func @_bilinear_nchw_kernel(%arg0: i32, %arg1: i32, %arg2: i32, %arg3: memref<16x4xf32, #tpu.memory_space<vmem>>, %arg4: memref<4x16xf32, #tpu.memory_space<vmem>>, %arg5: memref<1x2x4x4xf32, #tpu.memory_space<vmem>>, %arg6: memref<1x2x16x16xf32, #tpu.memory_space<vmem>>) attributes {dimension_semantics = [#tpu.dimension_semantics<parallel>, #tpu.dimension_semantics<parallel>, #tpu.dimension_semantics<parallel>], iteration_bounds = array<i64: 2, 1, 1>, scalar_prefetch = 0 : i64, scratch_operands = 0 : i64, tpu.core_type = #tpu.core_type<tc>, window_params = [{transform_indices = @transform_0, window_bounds = array<i64: 16, 4>}, {pipeline_mode = #tpu.pipeline_mode<synchronous>, transform_indices = @transform_1, window_bounds = array<i64: 4, 16>}, {transform_indices = @transform_2, window_bounds = array<i64: 1, 2, 4, 4>}, {transform_indices = @transform_3, window_bounds = array<i64: 1, 2, 16, 16>}]} {
    %c0 = arith.constant 0 : index
    %c0_0 = arith.constant 0 : index
    %0 = vector.load %arg3[%c0, %c0_0] : memref<16x4xf32, #tpu.memory_space<vmem>>, vector<16x4xf32>
    %c0_1 = arith.constant 0 : index
    %c0_2 = arith.constant 0 : index
    %c0_3 = arith.constant 0 : index
    %c0_4 = arith.constant 0 : index
    %1 = vector.load %arg5[%c0_1, %c0_2, %c0_3, %c0_4] : memref<1x2x4x4xf32, #tpu.memory_space<vmem>>, vector<1x1x4x4xf32>
    %2 = vector.shape_cast %1 : vector<1x1x4x4xf32> to vector<4x4xf32>
    %cst = arith.constant dense<0.000000e+00> : vector<16x4xf32>
    %3 = tpu.matmul %0, %2, %cst {dimension_numbers = #tpu.dot_dimension_numbers<[1], [0], [0], [1], [0, 0, 1, 1], [], []>} : vector<16x4xf32>, vector<4x4xf32>, vector<16x4xf32> -> vector<16x4xf32>
    %c0_5 = arith.constant 0 : index
    %c1 = arith.constant 1 : index
    %c0_6 = arith.constant 0 : index
    %c0_7 = arith.constant 0 : index
    %4 = vector.load %arg5[%c0_5, %c1, %c0_6, %c0_7] : memref<1x2x4x4xf32, #tpu.memory_space<vmem>>, vector<1x1x4x4xf32>
    %5 = vector.shape_cast %4 : vector<1x1x4x4xf32> to vector<4x4xf32>
    %cst_8 = arith.constant dense<0.000000e+00> : vector<16x4xf32>
    %6 = tpu.matmul %0, %5, %cst_8 {dimension_numbers = #tpu.dot_dimension_numbers<[1], [0], [0], [1], [0, 0, 1, 1], [], []>} : vector<16x4xf32>, vector<4x4xf32>, vector<16x4xf32> -> vector<16x4xf32>
    %7 = tpu.concatenate %3, %6 in 0 : vector<16x4xf32>, vector<16x4xf32> -> vector<32x4xf32>
    %c0_9 = arith.constant 0 : index
    %c0_10 = arith.constant 0 : index
    %8 = vector.load %arg4[%c0_9, %c0_10] : memref<4x16xf32, #tpu.memory_space<vmem>>, vector<4x16xf32>
    %cst_11 = arith.constant dense<0.000000e+00> : vector<32x16xf32>
    %9 = tpu.matmul %7, %8, %cst_11 {dimension_numbers = #tpu.dot_dimension_numbers<[1], [0], [0], [1], [0, 0, 1, 1], [], []>} : vector<32x4xf32>, vector<4x16xf32>, vector<32x16xf32> -> vector<32x16xf32>
    %10 = vector.extract_strided_slice %9 {offsets = [0, 0], sizes = [16, 16], strides = [1, 1]} : vector<32x16xf32> to vector<16x16xf32>
    %c0_12 = arith.constant 0 : index
    %c0_13 = arith.constant 0 : index
    %c0_14 = arith.constant 0 : index
    %c0_15 = arith.constant 0 : index
    %11 = vector.load %arg6[%c0_12, %c0_13, %c0_14, %c0_15] : memref<1x2x16x16xf32, #tpu.memory_space<vmem>>, vector<1x1x16x16xf32>
    %12 = vector.shape_cast %11 : vector<1x1x16x16xf32> to vector<16x16xf32>
    %13 = vector.shape_cast %10 : vector<16x16xf32> to vector<1x1x16x16xf32>
    tpu.vector_store %arg6[%c0_12, %c0_13, %c0_14, %c0_15], %13 {strides = array<i32>} : memref<1x2x16x16xf32, #tpu.memory_space<vmem>>, vector<1x1x16x16xf32>,
    %14 = vector.extract_strided_slice %9 {offsets = [16, 0], sizes = [16, 16], strides = [1, 1]} : vector<32x16xf32> to vector<16x16xf32>
    %c0_16 = arith.constant 0 : index
    %c1_17 = arith.constant 1 : index
    %c0_18 = arith.constant 0 : index
    %c0_19 = arith.constant 0 : index
    %15 = vector.load %arg6[%c0_16, %c1_17, %c0_18, %c0_19] : memref<1x2x16x16xf32, #tpu.memory_space<vmem>>, vector<1x1x16x16xf32>
    %16 = vector.shape_cast %15 : vector<1x1x16x16xf32> to vector<16x16xf32>
    %17 = vector.shape_cast %14 : vector<16x16xf32> to vector<1x1x16x16xf32>
    tpu.vector_store %arg6[%c0_16, %c1_17, %c0_18, %c0_19], %17 {strides = array<i32>} : memref<1x2x16x16xf32, #tpu.memory_space<vmem>>, vector<1x1x16x16xf32>,
    return
  }
  func.func @transform_0(%arg0: i32, %arg1: i32, %arg2: i32) -> (i32, i32) {
    %c0_i32 = arith.constant 0 : i32
    %c0_i32_0 = arith.constant 0 : i32
    return %arg2, %c0_i32 : i32, i32
  }
  func.func @transform_1(%arg0: i32, %arg1: i32, %arg2: i32) -> (i32, i32) {
    %c0_i32 = arith.constant 0 : i32
    %c0_i32_0 = arith.constant 0 : i32
    %c0_i32_1 = arith.constant 0 : i32
    return %c0_i32, %c0_i32_0 : i32, i32
  }
  func.func @transform_2(%arg0: i32, %arg1: i32, %arg2: i32) -> (i32, i32, i32, i32) {
    %c0_i32 = arith.constant 0 : i32
    %c0_i32_0 = arith.constant 0 : i32
    %c0_i32_1 = arith.constant 0 : i32
    return %arg0, %arg1, %c0_i32, %c0_i32_0 : i32, i32, i32, i32
  }
  func.func @transform_3(%arg0: i32, %arg1: i32, %arg2: i32) -> (i32, i32, i32, i32) {
    %c0_i32 = arith.constant 0 : i32
    %c0_i32_0 = arith.constant 0 : i32
    return %arg0, %arg1, %arg2, %c0_i32 : i32, i32, i32, i32
  }
}

</mosaic_0001>

<bundles_post_ra>
// kernel: model_wraper_forward.3
= control target key start
LH: loop header
LB: loop body
LE: loop exit
PB: predicated region body
PF: predicated region fallthrough
CT: control target
= control target key end

     0   :  { %s320_s12 = smov 0   ;;  %s343_s0 = inlined_call_operand.vmem [shape: f32[32,8], index: 0, kind: input, shape index: {}]   ;;  %s344_s1 = inlined_call_operand.vmem [shape: f32[8,128], index: 1, kind: input, shape index: {}]   ;;  %s345_s2 = inlined_call_operand.vmem [shape: f32[1,128], index: 2, kind: input, shape index: {}]   ;;  %s346_s3 = inlined_call_operand.vmem [shape: f32[32,128], index: 3, kind: output, shape index: {}]  }
   0x1 LB: > { %s269_s13 = sadd.s32 4294967295, %s298_s12   ;;  %p273_p0 = scmp.ge.s32.totalorder %s298_s12, 1  ;;  %s298_s12 = sphi %s320_s12, %s13_s12  }
   0x2   : > { %p138_p1 = scmp.lt.s32.totalorder %s298_s12, 3 }
   0x4   : > { %p139_p2 = pnand %p273_p0, %p138_p1 }
   0x5   : > { %s274_s16 = sshll.u32 (!%p139_p2), %s269_s13, 1 }
   0x6   : > { %142 = sbr.rel (%p139_p2) target bundleno = 145 (0x91), region = 32  ;;  %p163_p3 = scmp.lt.s32.totalorder (!%p139_p2), %s274_s16, 3 }
   0xb   : > { %v176_v0 = vld [vmem:[%s344_s1] sm:$0xff]  ;;  %s348_s16 = smov (!%p163_p3, %s274_s16), 3  ;;  %vm181_vm0 = vcmask 64512  }
   0xc   : > { %203 = vmatpush.msra.mxu0 %v176_v0  ;;  %282 = vmatpush.msra.mxu1 %v176_v0  ;;  %s275_s17 = sshll.u32 %s348_s16, 3  ;;  %v291_v3 = vld [vmem:[%s345_s2] ss:$0 sm:$0xff] }
   0xd   : > { %s166_s20 = scalar_lea.vmem %s343_s0, %s275_s17  ;;  %s172_s25 = scalar_lea.vmem %s346_s3, %s275_s17 }
   0xe   : > { %v174_v1 = vld [vmem:[%s166_s20] sm:$0xff]  ;;  %v175_v2 = vld [vmem:[%s166_s20 + $0x8] sm:$0xff] }
   0xf   : > { %278 = vmatmul.msk.f32.vlgmr.msra.gmra.mxu0 %vm181_vm0, %v174_v1  ;;  %279 = vmatmul.msk.f32.vlgmr.msra.gmra.mxu1 %vm181_vm0, %v175_v2 }
  0x8c   : > { %v205_v4 = vpop.f32.mrf.mxu0  ;;  %v208_v5 = vpop.f32.mrf.mxu1 }
  0x8d   : > { %v206_v6 = vadd.f32 %v291_v3, %v205_v4  ;;  %v209_v7 = vadd.f32 %v291_v3, %v208_v5 }
  0x8f   : > { %211 = vst [vmem:[%s172_s25] sm:$0xff] %v206_v6 }
  0x90   : > { %212 = vst [vmem:[%s172_s25 + $0x8] sm:$0xff] %v209_v7 }
  0x91 PF: > { %s13_s12 = sadd.s32 1, %s298_s12  }
  0x92   : > { %p10_p4 = scmp.ge.s32.totalorder %s13_s12, 4  }
  0x94   :  { %12 = sbr.rel (!%p10_p4) target bundleno = 1 (0x1), region = 62 }

// kernel: model_wraper_forward.4
= control target key start
LH: loop header
LB: loop body
LE: loop exit
PB: predicated region body
PF: predicated region fallthrough
CT: control target
= control target key end

     0   :  { %8 = vsyncpa [#allocation3], 0  ;;  %s772_s0 = inlined_call_operand.vmem [shape: f32[16,4], index: 0, kind: input, shape index: {}]   ;;  %s773_s1 = inlined_call_operand.vmem [shape: f32[4,16], index: 1, kind: input, shape index: {}]   ;;  %s774_s2 = inlined_call_operand.vmem [shape: f32[2,2,4,4], index: 2, kind: input, shape index: {}]   ;;  %s775_s3 = inlined_call_operand.hbm [shape: f32[2,2,16,16], index: 3, kind: output, shape index: {}]  }
   0x1   :  { %10 = vsyncpa [#allocation3 + $0x1], 0  ;;  %s658_s12 = smov 0   ;;  %s660_s13 = smov 0  }
   0x2   :  { %s662_s14 = smov 0   ;;  %s664_s15 = smov 0  }
   0x3   :  { %s666_s16 = smov 0   ;;  %s668_s17 = smov 0  }
   0x4 LB: > { %s468_s18 = sadd.s32 4294967295, %s634_s17   ;;  %s469_s19 = sadd.s32 4294967294, %s634_s17   ;;  %s634_s17 = sphi %s668_s17, %s16_s17   ;;  %s630_s16 = sphi %s666_s16, %s782_s16   ;;  %s626_s15 = sphi %s664_s15, %s781_s15   ;;  %s622_s14 = sphi %s662_s14, %s780_s14   ;;  %s618_s13 = sphi %s660_s13, %s779_s13   ;;  %s614_s12 = sphi %s658_s12, %s778_s12  }
   0x5   : > { %s35_s20 = sadd.s32 1, %s630_s16  ;;  %s121_s21 = sadd.s32 1, %s622_s14 }
   0x6   : > { %p37_p0 = scmp.ge.s32.totalorder %s35_s20, 2  ;;  %p131_p1 = scmp.ne.s32.totalorder %s622_s14, %s618_s13 }
   0x7   : > { %p132_p2 = scmp.eq.s32.totalorder %s468_s18, 1  ;;  %p137_p3 = scmp.ne.s32.totalorder %s618_s13, %s614_s12 }
   0x8   : > { %s784_s20 = smov (%p37_p0, %s35_s20), 0  ;;  %p138_p5 = scmp.eq.s32.totalorder %s469_s19, 1 }
   0x9   : > { %p698_p4 = por %p132_p2, %p131_p1  ;;  %s114_s23 = ssub.s32 %s630_s16, %s784_s20 }
   0xa   : > { %p473_p6 = scmp.ge.s32.totalorder %s634_s17, 1  ;;  %p119_p7 = scmp.eq.s32.totalorder %s114_s23, 0 }
   0xb   : > { %p705_p8 = por %p138_p5, %p137_p3  ;;  %p181_p9 = scmp.lt.s32.totalorder %s634_s17, 3 }
   0xc   : > { %s711_s25 = scalar_select %p119_p7, %s622_s14, %s121_s21  }
   0xd   : > { %p182_p10 = pnand %p473_p6, %p181_p9 }
   0xe   : > { %p221_p11 = scmp.lt.s32.totalorder (!%p182_p10), %s626_s15, 1  ;;  %s211_s10 = sand.u32 (!%p182_p10), 1, %s618_s13  }
   0xf   : > { %185 = sbr.rel (%p182_p10) target bundleno = 297 (0x129), region = 32  ;;  %s474_s11 = sshll.u32 (!%p182_p10), %s211_s10, 5 }
  0x10   : > { %s497_s18 = sshll.u32 (!%p182_p10), %s626_s15, 5  ;;  %s213_s19 = scalar_lea.vmem (!%p182_p10), [#allocation2], %s474_s11 }
  0x11   : > { %s349_s29 = scalar_lea.sflag (!%p182_p10), [#allocation3], %s211_s10  ;;  %s576_s6 = scalar_lea.hbm (!%p182_p10), %s775_s3, 64 }
  0x14   : > { %s222_s26 = scalar_select %p221_p11, %s626_s15, 1  ;;  %vm242_vm0 = vcmask 1043456   ;;  %v232_v0 = vld [vmem:[%s772_s0] sm:$0xff]  ;;  %vm235_vm1 = vcmask 31744   ;;  %v233_v3 = vld [vmem:[%s772_s0 + $0x8] sm:$0xff]  ;;  %vm342_vm2 = vcmask 130048  }
  0x15   : > { %v297_v4 = vld [vmem:[%s773_s1] sm:$0xf] }
  0x16   : > { %s496_s27 = sshll.u32 %s222_s26, 3  ;;  %484 = vmatpush.msk.msra.mxu2 %vm242_vm0, %v297_v4  ;;  %498 = vmatpush.msk.msra.mxu3 %vm242_vm0, %v297_v4  ;;  %s365_s26 = scalar_lea.hbm %s775_s3, %s497_s18 }
  0x17   : > { %s228_s30 = scalar_lea.vmem %s774_s2, %s496_s27  ;;  %s366_s27 = sshll.u32 %s213_s19, 4  ;;  %s367_s27 = int_to_ptr.vmem [resolvable:$true] %s366_s27 }
  0x18   : > { %v234_v1 = vld [vmem:[%s228_s30] sm:$0xf]  ;;  %v480_v2 = vld [vmem:[%s228_s30 + $0x4] sm:$0xf]  ;;  %s368_s28 = sshll.u32 %s365_s26, 4  ;;  %s369_s28 = int_to_ptr.hbm [resolvable:$true] %s368_s28 }
  0x19   : > { %477 = vmatpush.msk.msra.mxu0 %vm242_vm0, %v234_v1  ;;  %481 = vmatpush.msk.msra.mxu1 %vm242_vm0, %v480_v2  ;;  %s570_s15 = sshra.s32 %s369_s28, 4  ;;  %s571_s15 = int_to_ptr.hbm [resolvable:$true] %s570_s15 }
  0x1a   : > { %478 = vmatmul.msk.f32.vlgmr.msra.gmra.mxu0 %vm235_vm1, %v232_v0  ;;  %482 = vmatmul.msk.f32.vlgmr.msra.gmra.mxu1 %vm235_vm1, %v232_v0  ;;  %s572_s30 = scalar_lea.hbm %s571_s15, 32  ;;  %p577_p1 = scmp.lt.s32.totalorder %s571_s15, %s775_s3 }
  0x1b   : > { %p573_p12 = scmp.ne.s32.totalorder %s571_s15, %s572_s30  ;;  %p578_p2 = scmp.lt.s32.totalorder %s576_s6, %s572_s30 }
  0x1d   : > { %p574_p13 = pnand %p573_p12, %p698_p4  ;;  %p579_p3 = por %p578_p2, %p577_p1 }
  0x1f   : > { %p575_p0 = pneg %p574_p13 }
  0x21   : > { %p580_p5 = pnand %p579_p3, %p575_p0 }
  0x22   : > { %479 = vmatmul.msk.f32.gmra.mxu0 %vm235_vm1, %v233_v3  ;;  %483 = vmatmul.msk.f32.gmra.mxu1 %vm235_vm1, %v233_v3 }
  0x97   : > { %v263_v5 = vpop.f32.mrf.mxu0  ;;  %v291_v6 = vpop.f32.mrf.mxu1 }
  0x98   : > { %485 = vmatmul.msk.f32.vlgmr.msra.gmra.mxu2 %vm235_vm1, %v263_v5  ;;  %487 = vmatmul.msk.f32.vlgmr.msra.gmra.mxu3 %vm235_vm1, %v291_v6 }
  0x9f   : > { %v266_v7 = vpop.f32.mrf.mxu0  ;;  %v294_v8 = vpop.f32.mrf.mxu1 }
  0xa0   : > { %486 = vmatmul.msk.f32.gmra.mxu2 %vm235_vm1, %v266_v7  ;;  %488 = vmatmul.msk.f32.gmra.mxu3 %vm235_vm1, %v294_v8 }
 0x11b   : > { %v330_v9 = vpop.f32.mrf.mxu2  ;;  %v336_v10 = vpop.f32.mrf.mxu3 }
 0x11c   : > { %343 = vst.msk [vmem:[%s213_s19] sm:$0xff] %vm342_vm2, %v330_v9 }
 0x11d   : > { %489 = vst.msk [vmem:[%s213_s19 + $0x10] sm:$0xff] %vm342_vm2, %v336_v10 }
 0x123   : > { %v333_v11 = vpop.f32.mrf.mxu2  ;;  %v339_v12 = vpop.f32.mrf.mxu3 }
 0x124   : > { %344 = vst.msk [vmem:[%s213_s19 + $0x8] sm:$0xff] %vm342_vm2, %v333_v11 }
 0x125   : > { %490 = vst.msk [vmem:[%s213_s19 + $0x18] sm:$0xff] %vm342_vm2, %v339_v12 }
 0x126   : > { %583 = shalt.err (!%p580_p5)
}
 0x127   : > { %s636_s9 = smov 128   ;;  %s637_s10 = smov 8  }
 0x128   : > { %499 = dma.vmem_to_hbm [thread:$0]  (%p698_p4), %s367_s27, 512, %s369_s28, %s349_s29, %s636_s9, %s636_s9, %s637_s10  }
 0x129 PF: > { %p505_p6 = scmp.ge.s32.totalorder %s634_s17, 2  ;;  %s383_s11 = sand.u32 1, %s614_s12  }
 0x12a   : > { %s384_s18 = scalar_lea.sflag [#allocation3], %s383_s11 }
 0x12b   : > { %p502_p7 = pnand %p505_p6, %p705_p8 }
 0x12d   : > { %p503_p9 = pneg %p502_p7 }
 0x12f   : > { %609 = dma.done.wait (%p503_p9), %s384_s18, 512  }
 0x130   : > { %611 = vsyncadd (%p503_p9), %s384_s18, 4294966784  ;;  %s16_s17 = sadd.s32 1, %s634_s17   ;;  %s778_s12 = smov %s618_s13 }
 0x131   : > { %p13_p10 = scmp.ge.s32.totalorder %s16_s17, 4   ;;  %s779_s13 = smov %s622_s14 }
 0x132   : > { %s780_s14 = smov %s711_s25  ;;  %s781_s15 = smov %s630_s16 }
 0x133   : > { %s782_s16 = smov %s784_s20  ;;  %15 = sbr.rel (!%p13_p10) target bundleno = 4 (0x4), region = 72 }
 0x138   :  { %390 = vsyncpa [#allocation3], 1 }
 0x139   :  { %392 = vsyncpa [#allocation3 + $0x1], 1 }

// kernel: model_wraper_forward.5
= control target key start
LH: loop header
LB: loop body
LE: loop exit
PB: predicated region body
PF: predicated region fallthrough
CT: control target
= control target key end

     0   :  { %8 = vsyncpa [#allocation3], 0  ;;  %s959_s0 = inlined_call_operand.vmem [shape: f32[16,4], index: 0, kind: input, shape index: {}]   ;;  %s960_s1 = inlined_call_operand.vmem [shape: f32[4,16], index: 1, kind: input, shape index: {}]   ;;  %s961_s2 = inlined_call_operand.vmem [shape: f32[2,5,4,4], index: 2, kind: input, shape index: {}]   ;;  %s962_s3 = inlined_call_operand.hbm [shape: f32[2,5,16,16], index: 3, kind: output, shape index: {}]  }
   0x1   :  { %10 = vsyncpa [#allocation3 + $0x1], 0  ;;  %s810_s12 = smov 0   ;;  %s812_s13 = smov 0  }
   0x2   :  { %s814_s14 = smov 0   ;;  %s816_s15 = smov 0  }
   0x3   :  { %s818_s16 = smov 0   ;;  %s820_s17 = smov 0  }
   0x4 LB: > { %s597_s18 = sadd.s32 4294967295, %s786_s17   ;;  %s598_s19 = sadd.s32 4294967294, %s786_s17   ;;  %s786_s17 = sphi %s820_s17, %s16_s17   ;;  %s782_s16 = sphi %s818_s16, %s969_s16   ;;  %s778_s15 = sphi %s816_s15, %s968_s15   ;;  %s774_s14 = sphi %s814_s14, %s967_s14   ;;  %s770_s13 = sphi %s812_s13, %s966_s13   ;;  %s766_s12 = sphi %s810_s12, %s965_s12  }
   0x5   : > { %s35_s20 = sadd.s32 1, %s782_s16  ;;  %s121_s21 = sadd.s32 1, %s774_s14 }
   0x6   : > { %p37_p0 = scmp.ge.s32.totalorder %s35_s20, 2  ;;  %p131_p1 = scmp.ne.s32.totalorder %s774_s14, %s770_s13 }
   0x7   : > { %p132_p2 = scmp.eq.s32.totalorder %s597_s18, 1  ;;  %p137_p3 = scmp.ne.s32.totalorder %s770_s13, %s766_s12 }
   0x8   : > { %s971_s20 = smov (%p37_p0, %s35_s20), 0  ;;  %p138_p5 = scmp.eq.s32.totalorder %s598_s19, 1 }
   0x9   : > { %p850_p4 = por %p132_p2, %p131_p1  ;;  %s114_s23 = ssub.s32 %s782_s16, %s971_s20 }
   0xa   : > { %p602_p6 = scmp.ge.s32.totalorder %s786_s17, 1  ;;  %p119_p7 = scmp.eq.s32.totalorder %s114_s23, 0 }
   0xb   : > { %p857_p8 = por %p138_p5, %p137_p3  ;;  %p181_p9 = scmp.lt.s32.totalorder %s786_s17, 3 }
   0xc   : > { %s863_s25 = scalar_select %p119_p7, %s774_s14, %s121_s21  }
   0xd   : > { %p182_p10 = pnand %p602_p6, %p181_p9 }
   0xe   : > { %p221_p11 = scmp.lt.s32.totalorder (!%p182_p10), %s778_s15, 1  ;;  %s211_s10 = sand.u32 (!%p182_p10), 1, %s770_s13  }
   0xf   : > { %185 = sbr.rel (%p182_p10) target bundleno = 329 (0x149), region = 32  ;;  %s478_s29 = scalar_lea.sflag (!%p182_p10), [#allocation3], %s211_s10 }
  0x10   : > { %s648_s11 = smul.u32 (!%p182_p10), 80, %s211_s10  ;;  %s728_s6 = scalar_lea.hbm (!%p182_p10), %s962_s3, 160 }
  0x11   : > { %s650_s19 = smul.u32 (!%p182_p10), 80, %s778_s15 }
  0x12   : > { %s213_s18 = scalar_lea.vmem (!%p182_p10), [#allocation2], %s648_s11 }
  0x14   : > { %s222_s26 = scalar_select %p221_p11, %s778_s15, 1  ;;  %vm242_vm0 = vcmask 1043456   ;;  %v232_v0 = vld [vmem:[%s959_s0] sm:$0xff]  ;;  %vm235_vm1 = vcmask 31744   ;;  %v233_v6 = vld [vmem:[%s959_s0 + $0x8] sm:$0xff]  ;;  %vm462_vm2 = vcmask 130048  }
  0x15   : > { %v381_v7 = vld [vmem:[%s960_s1] sm:$0xf] }
  0x16   : > { %s649_s27 = smul.u32 20, %s222_s26  ;;  %s494_s26 = scalar_lea.hbm %s962_s3, %s650_s19 }
  0x17   : > { %s497_s28 = sshll.u32 %s494_s26, 4  ;;  %s498_s28 = int_to_ptr.hbm [resolvable:$true] %s497_s28 }
  0x18   : > { %s228_s30 = scalar_lea.vmem %s961_s2, %s649_s27  ;;  %s495_s27 = sshll.u32 %s213_s18, 4  ;;  %s496_s27 = int_to_ptr.vmem [resolvable:$true] %s495_s27 }
  0x19   : > { %v234_v1 = vld [vmem:[%s228_s30] sm:$0xf]  ;;  %v615_v2 = vld [vmem:[%s228_s30 + $0xc] sm:$0xf]  ;;  %v607_v3 = vld [vmem:[%s228_s30 + $0x4] sm:$0xf] }
  0x1a   : > { %604 = vmatpush.msk.msra.mxu0 %vm242_vm0, %v234_v1  ;;  %608 = vmatpush.msk.msra.mxu1 %vm242_vm0, %v607_v3  ;;  %v619_v4 = vld [vmem:[%s228_s30 + $0x10] sm:$0xf]  ;;  %v611_v5 = vld [vmem:[%s228_s30 + $0x8] sm:$0xf]  ;;  %s722_s30 = sshra.s32 %s498_s28, 4  ;;  %s723_s30 = int_to_ptr.hbm [resolvable:$true] %s722_s30 }
  0x1b   : > { %605 = vmatmul.msk.f32.vlgmr.msra.gmra.mxu0 %vm235_vm1, %v232_v0  ;;  %609 = vmatmul.msk.f32.vlgmr.msra.gmra.mxu1 %vm235_vm1, %v232_v0  ;;  %s724_s4 = scalar_lea.hbm %s723_s30, 80  ;;  %p729_p1 = scmp.lt.s32.totalorder %s723_s30, %s962_s3 }
  0x1c   : > { %616 = vmatpush.msk.msrb.mxu0 %vm242_vm0, %v615_v2  ;;  %645 = vmatpush.msk.msra.mxu3 %vm242_vm0, %v615_v2  ;;  %p725_p12 = scmp.ne.s32.totalorder %s723_s30, %s724_s4  ;;  %p730_p2 = scmp.lt.s32.totalorder %s728_s6, %s724_s4 }
  0x1d   : > { %618 = vmatmul.msk.f32.vlgmr.msra.gmra.mxu3 %vm235_vm1, %v233_v6  ;;  %612 = vmatpush.msk.msra.mxu2 %vm242_vm0, %v611_v5 }
  0x1e   : > { %620 = vmatpush.msk.msra.mxu0 %vm242_vm0, %v619_v4  ;;  %613 = vmatmul.msk.f32.vlgmr.msra.gmra.mxu2 %vm235_vm1, %v232_v0  ;;  %p726_p13 = pnand %p725_p12, %p850_p4  ;;  %p731_p3 = por %p730_p2, %p729_p1 }
  0x1f   : > { %623 = vmatpush.msk.msrb.mxu1 %vm242_vm0, %v381_v7  ;;  %646 = vmatpush.msk.msrb.mxu2 %vm242_vm0, %v381_v7 }
  0x20   : > { %647 = vmatpush.msk.msrb.mxu3 %vm242_vm0, %v381_v7  ;;  %p727_p0 = pneg %p726_p13 }
  0x22   : > { %p732_p5 = pnand %p731_p3, %p727_p0 }
  0x23   : > { %606 = vmatmul.msk.f32.gmra.mxu0 %vm235_vm1, %v233_v6  ;;  %610 = vmatmul.msk.f32.gmra.mxu1 %vm235_vm1, %v233_v6 }
  0x26   : > { %614 = vmatmul.msk.f32.gmra.mxu2 %vm235_vm1, %v233_v6 }
  0x2b   : > { %617 = vmatmul.msk.f32.vlgmr.msrb.gmra.mxu0 %vm235_vm1, %v232_v0 }
  0x33   : > { %621 = vmatmul.msk.f32.vlgmr.msra.gmra.mxu0 %vm235_vm1, %v232_v0 }
  0x3b   : > { %622 = vmatmul.msk.f32.gmra.mxu0 %vm235_vm1, %v233_v6 }
  0x98   : > { %v263_v8 = vpop.f32.mrf.mxu0  ;;  %v291_v9 = vpop.f32.mrf.mxu1 }
  0x99   : > { %624 = vmatmul.msk.f32.vlgmr.msrb.gmra.mxu1 %vm235_vm1, %v263_v8 }
  0xa0   : > { %v266_v10 = vpop.f32.mrf.mxu0  ;;  %v294_v11 = vpop.f32.mrf.mxu1 }
  0xa1   : > { %625 = vmatmul.msk.f32.gmra.mxu1 %vm235_vm1, %v266_v10  ;;  %627 = vmatmul.msk.f32.vlgmr.msrb.gmra.mxu2 %vm235_vm1, %v294_v11  ;;  %v319_v12 = vpop.f32.mrf.mxu2  ;;  %v350_v14 = vpop.f32.mrf.mxu3 }
  0xa8   : > { %v347_v13 = vpop.f32.mrf.mxu0 }
  0xa9   : > { %626 = vmatmul.msk.f32.gmra.mxu1 %vm235_vm1, %v291_v9  ;;  %630 = vmatmul.msk.f32.vlgmr.msrb.gmra.mxu3 %vm235_vm1, %v347_v13  ;;  %v322_v15 = vpop.f32.mrf.mxu2 }
  0xaa   : > { %628 = vmatmul.msk.f32.gmra.mxu2 %vm235_vm1, %v319_v12 }
  0xb0   : > { %v375_v16 = vpop.f32.mrf.mxu0 }
  0xb1   : > { %631 = vmatmul.msk.f32.gmra.mxu3 %vm235_vm1, %v350_v14 }
  0xb2   : > { %629 = vmatmul.msk.f32.gmra.mxu2 %vm235_vm1, %v322_v15 }
  0xb8   : > { %v378_v17 = vpop.f32.mrf.mxu0 }
  0xb9   : > { %632 = vmatmul.msk.f32.gmra.mxu3 %vm235_vm1, %v375_v16 }
  0xc1   : > { %633 = vmatmul.msk.f32.gmra.mxu3 %vm235_vm1, %v378_v17 }
 0x116   : > { %v432_v18 = vpop.f32.mrf.mxu1 }
 0x117   : > { %463 = vst.msk [vmem:[%s213_s18] sm:$0xff] %vm462_vm2, %v432_v18 }
 0x11e   : > { %v435_v19 = vpop.f32.mrf.mxu1 }
 0x11f   : > { %464 = vst.msk [vmem:[%s213_s18 + $0x8] sm:$0xff] %vm462_vm2, %v435_v19 }
 0x124   : > { %v441_v20 = vpop.f32.mrf.mxu2 }
 0x125   : > { %635 = vst.msk [vmem:[%s213_s18 + $0x18] sm:$0xff] %vm462_vm2, %v441_v20 }
 0x126   : > { %v438_v21 = vpop.f32.mrf.mxu1 }
 0x127   : > { %634 = vst.msk [vmem:[%s213_s18 + $0x10] sm:$0xff] %vm462_vm2, %v438_v21 }
 0x12c   : > { %v450_v22 = vpop.f32.mrf.mxu3 }
 0x12d   : > { %638 = vst.msk [vmem:[%s213_s18 + $0x30] sm:$0xff] %vm462_vm2, %v450_v22  ;;  %v444_v23 = vpop.f32.mrf.mxu2 }
 0x12e   : > { %636 = vst.msk [vmem:[%s213_s18 + $0x20] sm:$0xff] %vm462_vm2, %v444_v23 }
 0x134   : > { %v453_v24 = vpop.f32.mrf.mxu3 }
 0x135   : > { %639 = vst.msk [vmem:[%s213_s18 + $0x38] sm:$0xff] %vm462_vm2, %v453_v24  ;;  %v447_v25 = vpop.f32.mrf.mxu2 }
 0x136   : > { %637 = vst.msk [vmem:[%s213_s18 + $0x28] sm:$0xff] %vm462_vm2, %v447_v25 }
 0x13c   : > { %v456_v26 = vpop.f32.mrf.mxu3 }
 0x13d   : > { %640 = vst.msk [vmem:[%s213_s18 + $0x40] sm:$0xff] %vm462_vm2, %v456_v26 }
 0x144   : > { %v459_v27 = vpop.f32.mrf.mxu3 }
 0x145   : > { %641 = vst.msk [vmem:[%s213_s18 + $0x48] sm:$0xff] %vm462_vm2, %v459_v27 }
 0x146   : > { %735 = shalt.err (!%p732_p5)
}
 0x147   : > { %s788_s9 = smov 128   ;;  %s789_s10 = smov 8  }
 0x148   : > { %651 = dma.vmem_to_hbm [thread:$0]  (%p850_p4), %s496_s27, 1280, %s498_s28, %s478_s29, %s788_s9, %s788_s9, %s789_s10  }
 0x149 PF: > { %p657_p6 = scmp.ge.s32.totalorder %s786_s17, 2  ;;  %s512_s11 = sand.u32 1, %s766_s12  }
 0x14a   : > { %s513_s18 = scalar_lea.sflag [#allocation3], %s512_s11 }
 0x14b   : > { %p654_p7 = pnand %p657_p6, %p857_p8 }
 0x14d   : > { %p655_p9 = pneg %p654_p7 }
 0x14f   : > { %761 = dma.done.wait (%p655_p9), %s513_s18, 1280  }
 0x150   : > { %763 = vsyncadd (%p655_p9), %s513_s18, 4294966016  ;;  %s16_s17 = sadd.s32 1, %s786_s17   ;;  %s965_s12 = smov %s770_s13 }
 0x151   : > { %p13_p10 = scmp.ge.s32.totalorder %s16_s17, 4   ;;  %s966_s13 = smov %s774_s14 }
 0x152   : > { %s967_s14 = smov %s863_s25  ;;  %s968_s15 = smov %s782_s16 }
 0x153   : > { %s969_s16 = smov %s971_s20  ;;  %15 = sbr.rel (!%p13_p10) target bundleno = 4 (0x4), region = 78 }
 0x158   :  { %519 = vsyncpa [#allocation3], 1 }
 0x159   :  { %521 = vsyncpa [#allocation3 + $0x1], 1 }

</bundles_post_ra>
